<compile_context>
chip_gen: v5e
topology: v5e:2x2
jax: 0.10.0
libtpu: 0.0.40
codegen_flags: <defaults>
</compile_context>

<pallas_src>
import functools
import math

import jax
import jax.numpy as jnp
from jax.experimental import pallas as pl
from jax.experimental.pallas import tpu as pltpu


# ----------------------------- VMEM budget ---------------------------------

def _default_vmem_limit():
    try:
        cap = pltpu.get_tpu_info().vmem_capacity_bytes
    except Exception:
        cap = 128 * 1024 * 1024
    return int(min(64 * 1024 * 1024, cap // 2))


_VMEM_LIMIT = _default_vmem_limit()


# ----------------------------- Pallas kernels ------------------------------

def _fused_qkv_kernel(x_ref, w_ref, b_ref, o_ref):
    # Self-attention: one (tm, emb) @ (emb, 3*emb) bf16 matmul, f32 accumulate.
    x = x_ref[...].astype(jnp.bfloat16)
    y = jnp.dot(x, w_ref[...], preferred_element_type=jnp.float32) + b_ref[...]
    o_ref[...] = y.astype(o_ref.dtype)


def _split_qkv_kernel(xq_ref, xk_ref, xv_ref, wq_ref, wk_ref, wv_ref, b_ref, o_ref):
    # Distinct q/k/v inputs: three bf16 matmuls in ONE kernel, written straight into the
    # fused (tm, 3*emb) layout (no HBM concat, no extra launches).
    emb = wq_ref.shape[0]
    xq = xq_ref[...].astype(jnp.bfloat16)
    xk = xk_ref[...].astype(jnp.bfloat16)
    xv = xv_ref[...].astype(jnp.bfloat16)
    yq = jnp.dot(xq, wq_ref[...], preferred_element_type=jnp.float32) + b_ref[:, :emb]
    yk = jnp.dot(xk, wk_ref[...], preferred_element_type=jnp.float32) + b_ref[:, emb:2 * emb]
    yv = jnp.dot(xv, wv_ref[...], preferred_element_type=jnp.float32) + b_ref[:, 2 * emb:]
    o_ref[:, :emb] = yq.astype(o_ref.dtype)
    o_ref[:, emb:2 * emb] = yk.astype(o_ref.dtype)
    o_ref[:, 2 * emb:] = yv.astype(o_ref.dtype)


def _mha_attn_kernel(*refs, heads, d_k, tq, has_mask):
    # qkv_ref : (seq, 3*emb) bf16, [q_scaled | k | v] per row (1/sqrt(d_k) already in q)
    # mask_ref: (seq, seq) int8, nonzero = attend (optional)
    # wo_ref  : (emb, emb) bf16   bo_ref: (1, emb) f32
    # o_ref   : (tq, emb) f32  — already output-projected (out-linear fused in epilogue)
    if has_mask:
        qkv_ref, mask_ref, wo_ref, bo_ref, o_ref = refs
    else:
        qkv_ref, wo_ref, bo_ref, o_ref = refs
        mask_ref = None
    emb = heads * d_k
    qi = pl.program_id(1)
    q0 = pl.multiple_of(qi * tq, tq)

    keep = None
    if has_mask:
        keep = mask_ref[pl.ds(q0, tq), :] != 0                  # (tq, seq) bool

    acc = jnp.zeros((tq, emb), jnp.float32)
    for h in range(heads):                                       # static unroll over heads
        lo = h * d_k
        qh = qkv_ref[pl.ds(q0, tq), lo:lo + d_k]                 # (tq, d_k)  bf16 (pre-scaled)
        kh = qkv_ref[:, emb + lo:emb + lo + d_k]                 # (seq, d_k) bf16
        vh = qkv_ref[:, 2 * emb + lo:2 * emb + lo + d_k]         # (seq, d_k) bf16
        # contract over d_k without an explicit k.T (no XLU transpose)
        s = jax.lax.dot_general(qh, kh, (((1,), (1,)), ((), ())),
                                preferred_element_type=jnp.float32)   # (tq, seq) f32
        if has_mask:
            s = jnp.where(keep, s, -1e9)                         # masked_fill(mask == 0, -1e9)
        s = s - jnp.max(s, axis=-1, keepdims=True)               # stable softmax
        p = jnp.exp(s)
        p = p * pl.reciprocal(jnp.sum(p, axis=-1, keepdims=True), approx=True)
        pv = jnp.dot(p.astype(jnp.bfloat16), vh,
                     preferred_element_type=jnp.float32)         # (tq, d_k) f32
        # fused output projection: accumulate pv_h @ wo[h*d_k:(h+1)*d_k, :]
        woh = wo_ref[lo:lo + d_k, :]                             # (d_k, emb) bf16
        acc = acc + jnp.dot(pv.astype(jnp.bfloat16), woh,
                            preferred_element_type=jnp.float32)
    o_ref[...] = (acc + bo_ref[...]).astype(o_ref.dtype)


# ----------------------------- wrappers -------------------------------------

def _pick_tm(m, target=512):
    """M tile for the projection kernels: full M when small, else a capped, 16-aligned tile.
    The grid uses pl.cdiv, so a ragged tail is handled by Pallas block padding."""
    if m <= target:
        return m
    return target  # 512: multiple of 16 (bf16 sublane packing), well under the VMEM budget


def _pick_tq(seq, target=256):
    """Q tile for the attention kernel; must divide seq (in-kernel pl.ds slicing)."""
    if seq <= target:
        return seq
    for t in range(target, 7, -8):
        if seq % t == 0:
            return t
    return seq


def fused_qkv_pallas(x2d, w_bf16, b_f32, *, tm_target=512):
    """x2d: (M, emb) f32; w: (emb, 3*emb) bf16; b: (3*emb,) f32 -> (M, 3*emb) bf16."""
    M, K = x2d.shape
    N = w_bf16.shape[1]
    tm = _pick_tm(M, tm_target)
    cost = pl.CostEstimate(flops=2 * M * K * N, transcendentals=0,
                           bytes_accessed=4 * M * K + 2 * K * N + 4 * N + 2 * M * N)
    return pl.pallas_call(
        _fused_qkv_kernel,
        out_shape=jax.ShapeDtypeStruct((M, N), jnp.bfloat16),
        grid_spec=pltpu.PrefetchScalarGridSpec(
            num_scalar_prefetch=0,
            grid=(pl.cdiv(M, tm),),
            in_specs=[
                pl.BlockSpec((tm, K), lambda i: (i, 0)),
                pl.BlockSpec((K, N), lambda i: (0, 0)),   # resident weight
                pl.BlockSpec((1, N), lambda i: (0, 0)),
            ],
            out_specs=pl.BlockSpec((tm, N), lambda i: (i, 0)),
        ),
        compiler_params=pltpu.CompilerParams(
            dimension_semantics=("parallel",),
            vmem_limit_bytes=_VMEM_LIMIT,
        ),
        cost_estimate=cost,
    )(x2d, w_bf16, b_f32.reshape(1, N))


def split_qkv_pallas(xq, xk, xv, wq_bf16, wk_bf16, wv_bf16, b_f32, *, tm_target=512):
    """Distinct q/k/v inputs, one kernel.  Returns (M, 3*emb) bf16 in [q|k|v] layout."""
    M, K = xq.shape
    N = 3 * K
    tm = _pick_tm(M, tm_target)
    cost = pl.CostEstimate(flops=2 * M * K * N, transcendentals=0,
                           bytes_accessed=3 * 4 * M * K + 3 * 2 * K * K + 4 * N + 2 * M * N)
    return pl.pallas_call(
        _split_qkv_kernel,
        out_shape=jax.ShapeDtypeStruct((M, N), jnp.bfloat16),
        grid_spec=pltpu.PrefetchScalarGridSpec(
            num_scalar_prefetch=0,
            grid=(pl.cdiv(M, tm),),
            in_specs=[
                pl.BlockSpec((tm, K), lambda i: (i, 0)),
                pl.BlockSpec((tm, K), lambda i: (i, 0)),
                pl.BlockSpec((tm, K), lambda i: (i, 0)),
                pl.BlockSpec((K, K), lambda i: (0, 0)),
                pl.BlockSpec((K, K), lambda i: (0, 0)),
                pl.BlockSpec((K, K), lambda i: (0, 0)),
                pl.BlockSpec((1, N), lambda i: (0, 0)),
            ],
            out_specs=pl.BlockSpec((tm, N), lambda i: (i, 0)),
        ),
        compiler_params=pltpu.CompilerParams(
            dimension_semantics=("parallel",),
            vmem_limit_bytes=_VMEM_LIMIT,
        ),
        cost_estimate=cost,
    )(xq, xk, xv, wq_bf16, wk_bf16, wv_bf16, b_f32.reshape(1, N))


def attention_pallas(qkv, mask_i8, wo_bf16, bo_f32, heads, d_k):
    """qkv: (bs, seq, 3*emb) bf16 fused [q_scaled|k|v]; mask_i8: (bs, seq, seq) int8 or None.
    Returns (bs, seq, emb) f32: softmax(qk^T + mask) v, heads merged AND output-projected."""
    bs, seq, three_emb = qkv.shape
    emb = heads * d_k
    assert three_emb == 3 * emb
    tq = _pick_tq(seq)
    n_qt = seq // tq
    has_mask = mask_i8 is not None

    kernel = functools.partial(_mha_attn_kernel, heads=heads, d_k=d_k, tq=tq,
                               has_mask=has_mask)
    in_specs = [pl.BlockSpec((None, seq, 3 * emb), lambda b, qi: (b, 0, 0))]
    args = [qkv]
    if has_mask:
        in_specs.append(pl.BlockSpec((None, seq, seq), lambda b, qi: (b, 0, 0)))
        args.append(mask_i8)
    in_specs += [
        pl.BlockSpec((emb, emb), lambda b, qi: (0, 0)),   # resident wo
        pl.BlockSpec((1, emb), lambda b, qi: (0, 0)),     # resident bo
    ]
    args += [wo_bf16, bo_f32.reshape(1, emb)]

    cost = pl.CostEstimate(
        flops=4 * bs * heads * seq * seq * d_k + 2 * bs * seq * emb * emb,  # QK^T + PV + out-proj
        transcendentals=bs * heads * seq * seq,                              # exp
        bytes_accessed=(2 * bs * seq * 3 * emb + (bs * seq * seq if has_mask else 0)
                        + 2 * emb * emb + 4 * bs * seq * emb),
    )
    return pl.pallas_call(
        kernel,
        out_shape=jax.ShapeDtypeStruct((bs, seq, emb), jnp.float32),
        grid_spec=pltpu.PrefetchScalarGridSpec(
            num_scalar_prefetch=0,
            grid=(bs, n_qt),
            in_specs=in_specs,
            out_specs=pl.BlockSpec((None, tq, emb), lambda b, qi: (b, qi, 0)),
        ),
        compiler_params=pltpu.CompilerParams(
            dimension_semantics=("parallel", "parallel"),
            vmem_limit_bytes=_VMEM_LIMIT,
        ),
        cost_estimate=cost,
    )(*args)


class MultiHeadAttentionPallas:
    def __init__(self, heads, emb_dim, key, dropout=0.1):
        assert emb_dim % heads == 0
        self.h = heads
        self.emb_dim = emb_dim
        self.d_k = emb_dim // heads
        self.dropout_p = dropout  # eval-mode identity (see TODO at top)
        ks = jax.random.split(key, 8)
        bound = 1.0 / math.sqrt(emb_dim)

        def lin(kw, kb):
            # weight stored as (in, out) = W.T relative to nn.Linear
            w = jax.random.uniform(kw, (emb_dim, emb_dim), jnp.float32, -bound, bound)
            b = jax.random.uniform(kb, (emb_dim,), jnp.float32, -bound, bound)
            return w, b

        # fp32 reference parameters (PyTorch-equivalent)
        self.wq, self.bq = lin(ks[0], ks[1])
        self.wk, self.bk = lin(ks[2], ks[3])
        self.wv, self.bv = lin(ks[4], ks[5])
        self.wo, self.bo = lin(ks[6], ks[7])

        # kernel-side parameters: 1/sqrt(d_k) folded into q projection, bf16 weights
        scale = 1.0 / math.sqrt(self.d_k)
        wq_s = self.wq * scale
        bq_s = self.bq * scale
        self.w_qkv_bf16 = jnp.concatenate([wq_s, self.wk, self.wv], axis=1).astype(jnp.bfloat16)
        self.b_qkv = jnp.concatenate([bq_s, self.bk, self.bv]).astype(jnp.float32)
        self.wq_bf16 = wq_s.astype(jnp.bfloat16)
        self.wk_bf16 = self.wk.astype(jnp.bfloat16)
        self.wv_bf16 = self.wv.astype(jnp.bfloat16)
        self.wo_bf16 = self.wo.astype(jnp.bfloat16)

    def __call__(self, q, k, v, mask=None):
        bs, seq, emb = q.shape
        if (q is k) and (k is v):
            # self-attention: single fused (emb, 3*emb) projection matmul
            qkv2d = fused_qkv_pallas(q.reshape(bs * seq, emb), self.w_qkv_bf16, self.b_qkv)
        else:
            # distinct q/k/v: one kernel, three matmuls, fused output layout
            # TODO(synk): assumes k/v share q's (bs, seq); differing KV length unsupported.
            qkv2d = split_qkv_pallas(q.reshape(bs * seq, emb), k.reshape(bs * seq, emb),
                                     v.reshape(bs * seq, emb),
                                     self.wq_bf16, self.wk_bf16, self.wv_bf16, self.b_qkv)
        qkv = qkv2d.reshape(bs, seq, 3 * emb)

        m = None
        if mask is not None:
            m = (mask.reshape(bs, seq, seq) != 0).astype(jnp.int8)

        # attention + head merge + output projection all in one kernel
        return attention_pallas(qkv, m, self.wo_bf16, self.bo, self.h, self.d_k)


# ----------------------------- pure-JAX reference ---------------------------

def _reference(mha, q, k, v, mask=None):
    bs, seq, emb = q.shape
    lin = lambda x, w, b: x @ w + b
    split = lambda x: x.reshape(bs, seq, mha.h, mha.d_k).transpose(0, 2, 1, 3)
    qh = split(lin(q, mha.wq, mha.bq))
    kh = split(lin(k, mha.wk, mha.bk))
    vh = split(lin(v, mha.wv, mha.bv))
    scores = jnp.einsum("bhqd,bhkd->bhqk", qh, kh) / math.sqrt(mha.d_k)
    if mask is not None:
        scores = jnp.where(mask.reshape(bs, 1, seq, seq) == 0, -1e9, scores)
    p = jax.nn.softmax(scores, axis=-1)
    o = jnp.einsum("bhqk,bhkd->bhqd", p, vh)
    concat = o.transpose(0, 2, 1, 3).reshape(bs, seq, emb)
    return lin(concat, mha.wo, mha.bo)


if __name__ == "__main__":
    key = jax.random.PRNGKey(0)
    kx, kk, kv, km, kp = jax.random.split(key, 5)

    bs, seq, emb, heads = 2, 8, 32, 4
    x = jax.random.normal(kx, (bs, seq, emb), jnp.float32)
    k_in = jax.random.normal(kk, (bs, seq, emb), jnp.float32)
    v_in = jax.random.normal(kv, (bs, seq, emb), jnp.float32)
    # binary mask (bs, seq, seq); nonzero = attend
    mask = (jax.random.uniform(km, (bs, seq, seq)) > 0.2).astype(jnp.float32)

    mha = MultiHeadAttentionPallas(heads, emb, kp)

    # bf16 MXU operands (f32 accumulation) => tolerances cover bf16 rounding
    TOL = dict(atol=3e-2, rtol=3e-2)

    # 1) self-attention with mask (fused QKV path)
    out_sa = jax.block_until_ready(mha(x, x, x, mask))
    ref_sa = _reference(mha, x, x, x, mask)
    assert out_sa.shape == (bs, seq, emb)
    assert jnp.allclose(out_sa, ref_sa, **TOL), "self-attention (masked) mismatch vs reference"

    # 2) self-attention without mask (maskless kernel variant)
    out_nm = jax.block_until_ready(mha(x, x, x, None))
    ref_nm = _reference(mha, x, x, x, None)
    assert jnp.allclose(out_nm, ref_nm, **TOL), "self-attention (no mask) mismatch vs reference"

    # 3) distinct q/k/v (single fused split-projection kernel)
    out_x = jax.block_until_ready(mha(x, k_in, v_in, mask))
    ref_x = _reference(mha, x, k_in, v_in, mask)
    assert jnp.allclose(out_x, ref_x, **TOL), "cross-attention mismatch vs reference"

    print("KERNEL_OK")
</pallas_src>

<mosaic_0001>
module attributes {stable_mosaic.version = 11 : i64} {
  func.func @_fused_qkv_kernel(%arg0: i32, %arg1: memref<16x32xf32, #tpu.memory_space<vmem>>, %arg2: memref<32x96xbf16, #tpu.memory_space<vmem>>, %arg3: memref<1x96xf32, #tpu.memory_space<vmem>>, %arg4: memref<16x96xbf16, #tpu.memory_space<vmem>>) attributes {dimension_semantics = [#tpu.dimension_semantics<parallel>], iteration_bounds = array<i64: 1>, scalar_prefetch = 0 : i64, scratch_operands = 0 : i64, tpu.core_type = #tpu.core_type<tc>, window_params = [{transform_indices = @transform_0, window_bounds = array<i64: 16, 32>}, {pipeline_mode = #tpu.pipeline_mode<synchronous>, transform_indices = @transform_1, window_bounds = array<i64: 32, 96>}, {pipeline_mode = #tpu.pipeline_mode<synchronous>, transform_indices = @transform_2, window_bounds = array<i64: 1, 96>}, {transform_indices = @transform_3, window_bounds = array<i64: 16, 96>}]} {
    %c0 = arith.constant 0 : index
    %c0_0 = arith.constant 0 : index
    %0 = vector.load %arg1[%c0, %c0_0] : memref<16x32xf32, #tpu.memory_space<vmem>>, vector<16x32xf32>
    %1 = arith.truncf %0 : vector<16x32xf32> to vector<16x32xbf16>
    %c0_1 = arith.constant 0 : index
    %c0_2 = arith.constant 0 : index
    %2 = vector.load %arg2[%c0_1, %c0_2] : memref<32x96xbf16, #tpu.memory_space<vmem>>, vector<32x96xbf16>
    %cst = arith.constant dense<0.000000e+00> : vector<16x96xf32>
    %3 = tpu.matmul %1, %2, %cst {dimension_numbers = #tpu.dot_dimension_numbers<[1], [0], [0], [1], [0, 0, 1, 1], [], []>} : vector<16x32xbf16>, vector<32x96xbf16>, vector<16x96xf32> -> vector<16x96xf32>
    %c0_3 = arith.constant 0 : index
    %c0_4 = arith.constant 0 : index
    %4 = vector.load %arg3[%c0_3, %c0_4] : memref<1x96xf32, #tpu.memory_space<vmem>>, vector<1x96xf32>
    %5 = vector.broadcast %4 : vector<1x96xf32> to vector<16x96xf32>
    %6 = arith.addf %3, %5 : vector<16x96xf32>
    %7 = arith.truncf %6 : vector<16x96xf32> to vector<16x96xbf16>
    %c0_5 = arith.constant 0 : index
    %c0_6 = arith.constant 0 : index
    %8 = vector.load %arg4[%c0_5, %c0_6] : memref<16x96xbf16, #tpu.memory_space<vmem>>, vector<16x96xbf16>
    tpu.vector_store %arg4[%c0_5, %c0_6], %7 {strides = array<i32>} : memref<16x96xbf16, #tpu.memory_space<vmem>>, vector<16x96xbf16>,
    return
  }
  func.func @transform_0(%arg0: i32) -> (i32, i32) {
    %c0_i32 = arith.constant 0 : i32
    %c0_i32_0 = arith.constant 0 : i32
    return %arg0, %c0_i32 : i32, i32
  }
  func.func @transform_1(%arg0: i32) -> (i32, i32) {
    %c0_i32 = arith.constant 0 : i32
    %c0_i32_0 = arith.constant 0 : i32
    %c0_i32_1 = arith.constant 0 : i32
    return %c0_i32, %c0_i32_0 : i32, i32
  }
  func.func @transform_2(%arg0: i32) -> (i32, i32) {
    %c0_i32 = arith.constant 0 : i32
    %c0_i32_0 = arith.constant 0 : i32
    %c0_i32_1 = arith.constant 0 : i32
    return %c0_i32, %c0_i32_0 : i32, i32
  }
  func.func @transform_3(%arg0: i32) -> (i32, i32) {
    %c0_i32 = arith.constant 0 : i32
    %c0_i32_0 = arith.constant 0 : i32
    return %arg0, %c0_i32 : i32, i32
  }
}

</mosaic_0001>

<bundles_post_ra>
// kernel: tpu_custom_call.1
= control target key start
LH: loop header
LB: loop body
LE: loop exit
PB: predicated region body
PF: predicated region fallthrough
CT: control target
= control target key end

     0   :  { %8 = vsyncpa [#allocation3], 0  ;;  %s256_s0 = inlined_call_operand.hbm [shape: f32[16,32], index: 0, kind: input, shape index: {}]   ;;  %s257_s1 = inlined_call_operand.hbm [shape: bf16[32,96], index: 1, kind: input, shape index: {}]   ;;  %s258_s2 = inlined_call_operand.vmem [shape: f32[1,96], index: 2, kind: input, shape index: {}]   ;;  %s259_s3 = inlined_call_operand.hbm [shape: bf16[16,96], index: 3, kind: output, shape index: {}]  }
   0x1   :  { %9 = vsyncpa [#allocation6], 0 }
   0x2   :  { %10 = vsyncpa [#allocation4], 0  ;;  %s15_s14 = sshll.u32 %s256_s0, 4  ;;  %s211_s15 = smov [#allocation2]   ;;  %s16_s14 = int_to_ptr.hbm [resolvable:$true] %s15_s14 }
   0x3   :  { %s17_s16 = sshll.u32 %s211_s15, 4  ;;  %s28_s19 = sshll.u32 %s257_s1, 4  ;;  %s18_s16 = int_to_ptr.vmem [resolvable:$true] %s17_s16  ;;  %s29_s19 = int_to_ptr.hbm [resolvable:$true] %s28_s19 }
   0x4   :  { %s212_s20 = smov 128   ;;  %s213_s21 = smov 8  }
   0x5   :  { %23 = dma.hbm_to_vmem [thread:$0]  %s16_s14, 256, %s18_s16, [#allocation3], %s212_s20, %s212_s20, %s213_s21  }
   0x6   :  { %s214_s22 = smov [#allocation5]   ;;  %s215_s24 = smov 64  }
   0x7   :  { %s30_s23 = sshll.u32 %s214_s22, 4  ;;  %s216_s25 = smov 4   ;;  %s31_s23 = int_to_ptr.vmem [resolvable:$true] %s30_s23 }
   0x8   :  { %36 = dma.hbm_to_vmem [thread:$0]  %s29_s19, 256, %s31_s23, [#allocation6], %s215_s24, %s215_s24, %s216_s25  }
   0x9   :  { %205 = dma.done.wait [#allocation3], 256  }
   0xa   :  { %206 = vsyncadd [#allocation3], 4294967040 }
   0xb   :  { %207 = dma.done.wait [#allocation6], 256  }
   0xc   :  { %208 = vsyncadd [#allocation6], 4294967040  ;;  %v124_v0 = vld [vmem:[#allocation5 + $0x8] sm:$0xff]  ;;  %v123_v1 = vld [vmem:[#allocation5] sm:$0xff]  ;;  %vm71_vm0 = vcmask 261120   ;;  %vm91_vm1 = vcmask 781312  }
   0xd   :  { %81 = vmatpush.bf16.msra.mxu0 %v124_v0  ;;  %v48_v2 = vld [vmem:[#allocation2] sm:$0xff]  ;;  %v49_v3 = vld [vmem:[#allocation2 + $0x8] sm:$0xff]  ;;  %s217_s26 = smov [#allocation7]   ;;  %s100_s30 = sshll.u32 %s259_s3, 4  ;;  %s101_s30 = int_to_ptr.hbm [resolvable:$true] %s100_s30 }
   0xe   :  { %v50_v4 = vpack.c.bf16 %v49_v3, %v48_v2  ;;  %v132_v5 = vld [vmem:[%s258_s2] ss:$0 sm:$0xff]  ;;  %s98_s27 = sshll.u32 %s217_s26, 4  ;;  %s99_s27 = int_to_ptr.vmem [resolvable:$true] %s98_s27 }
  0x11   :  { %82 = vmatpush.bf16.msra.mxu0 %v123_v1 }
  0x14   :  { %122 = vmatmul.msk.bf16.vlgmr.msra.gmra.mxu0 %vm71_vm0, %v50_v4 }
  0x91   :  { %v84_v6 = vpop.f32.mrf.mxu0 }
  0x92   :  { %v85_v7 = vadd.f32 %v132_v5, %v84_v6 }
  0x94   :  { %v89_v8 = vpack.c.bf16 %v85_v7, %v85_v7 }
  0x96   :  { %92 = vst.msk [vmem:[#allocation7] sm:$0xf] %vm91_vm1, %v89_v8 }
  0x99   :  { %v86_v9 = vpop.f32.mrf.mxu0 }
  0x9a   :  { %v87_v10 = vadd.f32 %v132_v5, %v86_v9 }
  0x9c   :  { %v90_v11 = vpack.c.bf16 %v87_v10, %v87_v10 }
  0x9e   :  { %93 = vst.msk [vmem:[#allocation7 + $0x4] sm:$0xf] %vm91_vm1, %v90_v11 }
  0x9f   :  { %106 = dma.vmem_to_hbm [thread:$0]  %s99_s27, 128, %s101_s30, [#allocation4], %s215_s24, %s215_s24, %s216_s25  }
  0xa0   :  { %209 = dma.done.wait [#allocation4], 128  }
  0xa1   :  { %210 = vsyncadd [#allocation4], 4294967168 }
  0xa2   :  { %111 = vsyncpa [#allocation3], 1 }
  0xa3   :  { %112 = vsyncpa [#allocation6], 1 }
  0xa4   :  { %113 = vsyncpa [#allocation4], 1 }

</bundles_post_ra>
